<compile_context>
chip_gen: v6e
topology: v6e:2x2x1
jax: 0.10.0
libtpu: 0.0.40
codegen_flags: <defaults>
</compile_context>

<pallas_src>
import functools

import jax
import jax.numpy as jnp
import numpy as np
from jax import lax
from jax.experimental import pallas as pl
from jax.experimental.pallas import tpu as pltpu


def _residual_stack_kernel(x_ref, masks_ref, w1_ref, b1_ref, w2_ref, b2_ref, o_ref,
                           *, num_layers, W_img, Ch, ksize):
  """Fused ResidualStack for one batch slab.

  x_ref    : (1, Ch, Nb*HW)      input activations (channels on sublanes, batch*pixels on lanes)
  masks_ref: (k*k, Nb*HW)        per-tap border-validity masks (per-image coordinates)
  w1_ref   : (L, Crp, k*k*Ch)    3x3 conv weights, im2col-packed along K, Cr padded to Crp
  b1_ref   : (L, Crp, 1)         3x3 conv bias (zero-padded)
  w2_ref   : (L, Ch, Crp)        1x1 conv weights (zero-padded along Crp)
  b2_ref   : (L, Ch, 1)          1x1 conv bias
  o_ref    : (1, Ch, Nb*HW)      output activations
  """
  p = ksize // 2
  x = x_ref[0]                      # (Ch, NbHW) f32
  lanes = x.shape[1]                # Nb*HW (static)

  # Load masks once; reuse across layers.
  m_all = masks_ref[...]            # (k*k, NbHW)
  mask_list = [m_all[t:t + 1, :] for t in range(ksize * ksize)]

  for l in range(num_layers):
    # x_i = relu(x)
    a = jnp.maximum(x, 0.0)         # (Ch, NbHW)

    # im2col slab as a register value: 9 lane-rolled, border-masked copies stacked on
    # the sublane axis -> (k*k*Ch, NbHW).  Rolls stay within an image because offsets
    # that cross an image boundary correspond exactly to masked-off border taps.
    taps = []
    for dy in range(ksize):
      for dx in range(ksize):
        t = dy * ksize + dx
        offset = (dy - p) * W_img + (dx - p)
        shifted = pltpu.roll(a, (-offset) % lanes, axis=1) if offset else a
        taps.append(shifted * mask_list[t])
    slab = jnp.concatenate(taps, axis=0)   # (k*k*Ch, NbHW)

    # 3x3 conv as a single MXU matmul; bias + relu fused.
    acc = jnp.dot(w1_ref[l], slab, preferred_element_type=jnp.float32)
    acc = jnp.maximum(acc + b1_ref[l], 0.0)                       # (Crp, NbHW)

    # 1x1 conv: (Ch, Crp) @ (Crp, NbHW) + bias.  Padded Crp rows of acc are zero.
    z = jnp.dot(w2_ref[l], acc, preferred_element_type=jnp.float32) + b2_ref[l]

    # residual add
    x = x + z

  # final activation, lane-dense store
  o_ref[0] = jnp.maximum(x, 0.0)


def _num_parallel_blocks(batch):
  """2 blocks on v7x (2 TensorCores) when the batch splits evenly, else 1."""
  try:
    kind = jax.devices()[0].device_kind.lower()
  except Exception:
    kind = ""
  if "v7" in kind and batch % 2 == 0 and batch >= 2:
    return 2
  return 1


def residual_stack_forward(x_nchw, w1_oihw, b1, w2_oihw, b2):
  """Pallas-backed ResidualStack forward.

  x_nchw : (N, Ch, H, W)        float32 input (PyTorch NCHW layout)
  w1_oihw: (L, Cr, Ch, k, k)    PyTorch OIHW 3x3 conv weights
  b1     : (L, Cr)
  w2_oihw: (L, Ch, Cr, 1, 1)    PyTorch OIHW 1x1 conv weights
  b2     : (L, Ch)
  returns (N, Ch, H, W)
  """
  L, Cr, Ch, ks, _ = w1_oihw.shape
  N, _, H, W = x_nchw.shape
  HW = H * W
  KK = ks * ks * Ch
  Crp = ((Cr + 7) // 8) * 8           # pad residual channels to one sublane group
  p = ks // 2

  # Grid / batch folding: G blocks of Nb images each, images concatenated on the lane axis.
  G = _num_parallel_blocks(N)
  Nb = N // G
  NbHW = Nb * HW

  # NCHW -> (G, Ch, Nb*HW): flatten spatial, fold Nb images into lanes per block.
  x = x_nchw.reshape(N, Ch, HW).astype(jnp.float32)
  x = x.reshape(G, Nb, Ch, HW).transpose(0, 2, 1, 3).reshape(G, Ch, NbHW)

  # OIHW -> (L, Crp, k*k*Ch) with K flat index = (dy*k + dx)*Ch + c (matches slab order).
  w1 = jnp.transpose(w1_oihw, (0, 1, 3, 4, 2)).reshape(L, Cr, KK).astype(jnp.float32)
  w1 = jnp.pad(w1, ((0, 0), (0, Crp - Cr), (0, 0)))
  b1r = jnp.pad(b1.astype(jnp.float32), ((0, 0), (0, Crp - Cr))).reshape(L, Crp, 1)
  # (L, Ch, Cr, 1, 1) -> (L, Ch, Crp)
  w2 = jnp.pad(w2_oihw[..., 0, 0].astype(jnp.float32), ((0, 0), (0, 0), (0, Crp - Cr)))
  b2r = b2.reshape(L, Ch, 1).astype(jnp.float32)

  # Host-precomputed border masks, per-image coordinates (idx % HW) so taps never
  # bleed across the images folded into the lane axis.  Grid-invariant input.
  idx = np.arange(NbHW)
  pix = idx % HW
  h_idx = pix // W
  w_idx = pix % W
  mask_rows = []
  for dy in range(ks):
    for dx in range(ks):
      hh = h_idx + (dy - p)
      ww = w_idx + (dx - p)
      valid = (hh >= 0) & (hh < H) & (ww >= 0) & (ww < W)
      mask_rows.append(valid.astype(np.float32))
  masks = jnp.asarray(np.stack(mask_rows, axis=0))          # (k*k, Nb*HW)

  kernel = functools.partial(_residual_stack_kernel, num_layers=L, W_img=W,
                             Ch=Ch, ksize=ks)

  out = pl.pallas_call(
      kernel,
      out_shape=jax.ShapeDtypeStruct((G, Ch, NbHW), jnp.float32),
      grid_spec=pltpu.PrefetchScalarGridSpec(
          num_scalar_prefetch=0,
          grid=(G,),
          in_specs=[
              pl.BlockSpec((1, Ch, NbHW), lambda g: (g, 0, 0)),
              pl.BlockSpec((ks * ks, NbHW), lambda g: (0, 0)),
              pl.BlockSpec((L, Crp, KK), lambda g: (0, 0, 0)),
              pl.BlockSpec((L, Crp, 1), lambda g: (0, 0, 0)),
              pl.BlockSpec((L, Ch, Crp), lambda g: (0, 0, 0)),
              pl.BlockSpec((L, Ch, 1), lambda g: (0, 0, 0)),
          ],
          out_specs=pl.BlockSpec((1, Ch, NbHW), lambda g: (g, 0, 0)),
      ),
      compiler_params=pltpu.CompilerParams(
          dimension_semantics=("parallel",)),
  )(x, masks, w1, b1r, w2, b2r)

  # (G, Ch, Nb*HW) -> (N, Ch, H, W)
  out = out.reshape(G, Ch, Nb, HW).transpose(0, 2, 1, 3).reshape(N, Ch, H, W)
  return out


def residual_stack_reference(x_nchw, w1_oihw, b1, w2_oihw, b2):
  """Pure-JAX reference (lax.conv) with the same semantics."""
  L = w1_oihw.shape[0]
  x = jnp.transpose(x_nchw, (0, 2, 3, 1)).astype(jnp.float32)  # NHWC
  for l in range(L):
    a = jax.nn.relu(x)
    w = jnp.transpose(w1_oihw[l], (2, 3, 1, 0))  # OIHW -> HWIO
    y = lax.conv_general_dilated(a, w.astype(jnp.float32), (1, 1), "SAME",
                                 dimension_numbers=("NHWC", "HWIO", "NHWC"))
    y = y + b1[l]
    y = jax.nn.relu(y)
    w2 = jnp.transpose(w2_oihw[l], (2, 3, 1, 0))
    z = lax.conv_general_dilated(y, w2.astype(jnp.float32), (1, 1), "SAME",
                                 dimension_numbers=("NHWC", "HWIO", "NHWC"))
    z = z + b2[l]
    x = x + z
  x = jax.nn.relu(x)
  return jnp.transpose(x, (0, 3, 1, 2))


if __name__ == "__main__":
  # Small, deterministic configuration.
  N, H, W = 2, 16, 16
  num_hiddens = 8            # Ch
  num_residual_hiddens = 4   # Cr
  num_residual_layers = 2    # L
  filter_size = 3            # k

  key = jax.random.PRNGKey(0)
  kx, kw1, kb1, kw2, kb2 = jax.random.split(key, 5)

  x = jax.random.normal(kx, (N, num_hiddens, H, W), dtype=jnp.float32)
  w1 = 0.1 * jax.random.normal(
      kw1, (num_residual_layers, num_residual_hiddens, num_hiddens,
            filter_size, filter_size), dtype=jnp.float32)
  b1 = 0.1 * jax.random.normal(
      kb1, (num_residual_layers, num_residual_hiddens), dtype=jnp.float32)
  w2 = 0.1 * jax.random.normal(
      kw2, (num_residual_layers, num_hiddens, num_residual_hiddens, 1, 1),
      dtype=jnp.float32)
  b2 = 0.1 * jax.random.normal(
      kb2, (num_residual_layers, num_hiddens), dtype=jnp.float32)

  out = residual_stack_forward(x, w1, b1, w2, b2)
  out = jax.block_until_ready(out)

  ref = jax.block_until_ready(residual_stack_reference(x, w1, b1, w2, b2))
  np.testing.assert_allclose(np.asarray(out), np.asarray(ref),
                             rtol=1e-3, atol=1e-3)

  print("KERNEL_OK")
</pallas_src>

<mosaic_0001>
module attributes {stable_mosaic.version = 11 : i64} {
  func.func @_residual_stack_kernel(%arg0: i32, %arg1: memref<1x8x512xf32, #tpu.memory_space<vmem>>, %arg2: memref<9x512xf32, #tpu.memory_space<vmem>>, %arg3: memref<2x8x72xf32, #tpu.memory_space<vmem>>, %arg4: memref<2x8x1xf32, #tpu.memory_space<vmem>>, %arg5: memref<2x8x8xf32, #tpu.memory_space<vmem>>, %arg6: memref<2x8x1xf32, #tpu.memory_space<vmem>>, %arg7: memref<1x8x512xf32, #tpu.memory_space<vmem>>) attributes {dimension_semantics = [#tpu.dimension_semantics<parallel>], iteration_bounds = array<i64: 1>, scalar_prefetch = 0 : i64, scratch_operands = 0 : i64, tpu.core_type = #tpu.core_type<tc>, window_params = [{transform_indices = @transform_0, window_bounds = array<i64: 1, 8, 512>}, {pipeline_mode = #tpu.pipeline_mode<synchronous>, transform_indices = @transform_1, window_bounds = array<i64: 9, 512>}, {pipeline_mode = #tpu.pipeline_mode<synchronous>, transform_indices = @transform_2, window_bounds = array<i64: 2, 8, 72>}, {pipeline_mode = #tpu.pipeline_mode<synchronous>, transform_indices = @transform_3, window_bounds = array<i64: 2, 8, 1>}, {pipeline_mode = #tpu.pipeline_mode<synchronous>, transform_indices = @transform_4, window_bounds = array<i64: 2, 8, 8>}, {pipeline_mode = #tpu.pipeline_mode<synchronous>, transform_indices = @transform_5, window_bounds = array<i64: 2, 8, 1>}, {transform_indices = @transform_6, window_bounds = array<i64: 1, 8, 512>}]} {
    %c0 = arith.constant 0 : index
    %c0_0 = arith.constant 0 : index
    %c0_1 = arith.constant 0 : index
    %0 = vector.load %arg1[%c0, %c0_0, %c0_1] : memref<1x8x512xf32, #tpu.memory_space<vmem>>, vector<1x8x512xf32>
    %1 = vector.shape_cast %0 : vector<1x8x512xf32> to vector<8x512xf32>
    %c0_2 = arith.constant 0 : index
    %c0_3 = arith.constant 0 : index
    %2 = vector.load %arg2[%c0_2, %c0_3] : memref<9x512xf32, #tpu.memory_space<vmem>>, vector<9x512xf32>
    %3 = vector.extract_strided_slice %2 {offsets = [0, 0], sizes = [1, 512], strides = [1, 1]} : vector<9x512xf32> to vector<1x512xf32>
    %4 = vector.extract_strided_slice %2 {offsets = [1, 0], sizes = [1, 512], strides = [1, 1]} : vector<9x512xf32> to vector<1x512xf32>
    %5 = vector.extract_strided_slice %2 {offsets = [2, 0], sizes = [1, 512], strides = [1, 1]} : vector<9x512xf32> to vector<1x512xf32>
    %6 = vector.extract_strided_slice %2 {offsets = [3, 0], sizes = [1, 512], strides = [1, 1]} : vector<9x512xf32> to vector<1x512xf32>
    %7 = vector.extract_strided_slice %2 {offsets = [4, 0], sizes = [1, 512], strides = [1, 1]} : vector<9x512xf32> to vector<1x512xf32>
    %8 = vector.extract_strided_slice %2 {offsets = [5, 0], sizes = [1, 512], strides = [1, 1]} : vector<9x512xf32> to vector<1x512xf32>
    %9 = vector.extract_strided_slice %2 {offsets = [6, 0], sizes = [1, 512], strides = [1, 1]} : vector<9x512xf32> to vector<1x512xf32>
    %10 = vector.extract_strided_slice %2 {offsets = [7, 0], sizes = [1, 512], strides = [1, 1]} : vector<9x512xf32> to vector<1x512xf32>
    %11 = vector.extract_strided_slice %2 {offsets = [8, 0], sizes = [1, 512], strides = [1, 1]} : vector<9x512xf32> to vector<1x512xf32>
    %cst = arith.constant 0.000000e+00 : f32
    %12 = vector.broadcast %cst : f32 to vector<8x512xf32>
    %13 = arith.maximumf %1, %12 : vector<8x512xf32>
    %c17_i32 = arith.constant 17 : i32
    %14 = tpu.dynamic_rotate %13 by %c17_i32 dim 1 : vector<8x512xf32>, i32 -> vector<8x512xf32>
    %15 = vector.broadcast %3 : vector<1x512xf32> to vector<8x512xf32>
    %16 = arith.mulf %14, %15 : vector<8x512xf32>
    %c16_i32 = arith.constant 16 : i32
    %17 = tpu.dynamic_rotate %13 by %c16_i32 dim 1 : vector<8x512xf32>, i32 -> vector<8x512xf32>
    %18 = vector.broadcast %4 : vector<1x512xf32> to vector<8x512xf32>
    %19 = arith.mulf %17, %18 : vector<8x512xf32>
    %c15_i32 = arith.constant 15 : i32
    %20 = tpu.dynamic_rotate %13 by %c15_i32 dim 1 : vector<8x512xf32>, i32 -> vector<8x512xf32>
    %21 = vector.broadcast %5 : vector<1x512xf32> to vector<8x512xf32>
    %22 = arith.mulf %20, %21 : vector<8x512xf32>
    %c1_i32 = arith.constant 1 : i32
    %23 = tpu.dynamic_rotate %13 by %c1_i32 dim 1 : vector<8x512xf32>, i32 -> vector<8x512xf32>
    %24 = vector.broadcast %6 : vector<1x512xf32> to vector<8x512xf32>
    %25 = arith.mulf %23, %24 : vector<8x512xf32>
    %26 = vector.broadcast %7 : vector<1x512xf32> to vector<8x512xf32>
    %27 = arith.mulf %13, %26 : vector<8x512xf32>
    %c511_i32 = arith.constant 511 : i32
    %28 = tpu.dynamic_rotate %13 by %c511_i32 dim 1 : vector<8x512xf32>, i32 -> vector<8x512xf32>
    %29 = vector.broadcast %8 : vector<1x512xf32> to vector<8x512xf32>
    %30 = arith.mulf %28, %29 : vector<8x512xf32>
    %c497_i32 = arith.constant 497 : i32
    %31 = tpu.dynamic_rotate %13 by %c497_i32 dim 1 : vector<8x512xf32>, i32 -> vector<8x512xf32>
    %32 = vector.broadcast %9 : vector<1x512xf32> to vector<8x512xf32>
    %33 = arith.mulf %31, %32 : vector<8x512xf32>
    %c496_i32 = arith.constant 496 : i32
    %34 = tpu.dynamic_rotate %13 by %c496_i32 dim 1 : vector<8x512xf32>, i32 -> vector<8x512xf32>
    %35 = vector.broadcast %10 : vector<1x512xf32> to vector<8x512xf32>
    %36 = arith.mulf %34, %35 : vector<8x512xf32>
    %c495_i32 = arith.constant 495 : i32
    %37 = tpu.dynamic_rotate %13 by %c495_i32 dim 1 : vector<8x512xf32>, i32 -> vector<8x512xf32>
    %38 = vector.broadcast %11 : vector<1x512xf32> to vector<8x512xf32>
    %39 = arith.mulf %37, %38 : vector<8x512xf32>
    %40 = tpu.concatenate %16, %19, %22, %25, %27, %30, %33, %36, %39 in 0 : vector<8x512xf32>, vector<8x512xf32>, vector<8x512xf32>, vector<8x512xf32>, vector<8x512xf32>, vector<8x512xf32>, vector<8x512xf32>, vector<8x512xf32>, vector<8x512xf32> -> vector<72x512xf32>
    %c0_4 = arith.constant 0 : index
    %c0_5 = arith.constant 0 : index
    %c0_6 = arith.constant 0 : index
    %41 = vector.load %arg3[%c0_4, %c0_5, %c0_6] : memref<2x8x72xf32, #tpu.memory_space<vmem>>, vector<1x8x72xf32>
    %42 = vector.shape_cast %41 : vector<1x8x72xf32> to vector<8x72xf32>
    %cst_7 = arith.constant dense<0.000000e+00> : vector<8x512xf32>
    %43 = tpu.matmul %42, %40, %cst_7 {dimension_numbers = #tpu.dot_dimension_numbers<[1], [0], [0], [1], [0, 0, 1, 1], [], []>} : vector<8x72xf32>, vector<72x512xf32>, vector<8x512xf32> -> vector<8x512xf32>
    %c0_8 = arith.constant 0 : index
    %c0_9 = arith.constant 0 : index
    %c0_10 = arith.constant 0 : index
    %44 = vector.load %arg4[%c0_8, %c0_9, %c0_10] : memref<2x8x1xf32, #tpu.memory_space<vmem>>, vector<1x8x1xf32>
    %45 = vector.shape_cast %44 : vector<1x8x1xf32> to vector<8x1xf32>
    %46 = vector.broadcast %45 : vector<8x1xf32> to vector<8x512xf32>
    %47 = arith.addf %43, %46 : vector<8x512xf32>
    %cst_11 = arith.constant 0.000000e+00 : f32
    %48 = vector.broadcast %cst_11 : f32 to vector<8x512xf32>
    %49 = arith.maximumf %47, %48 : vector<8x512xf32>
    %c0_12 = arith.constant 0 : index
    %c0_13 = arith.constant 0 : index
    %c0_14 = arith.constant 0 : index
    %50 = vector.load %arg5[%c0_12, %c0_13, %c0_14] : memref<2x8x8xf32, #tpu.memory_space<vmem>>, vector<1x8x8xf32>
    %51 = vector.shape_cast %50 : vector<1x8x8xf32> to vector<8x8xf32>
    %cst_15 = arith.constant dense<0.000000e+00> : vector<8x512xf32>
    %52 = tpu.matmul %51, %49, %cst_15 {dimension_numbers = #tpu.dot_dimension_numbers<[1], [0], [0], [1], [0, 0, 1, 1], [], []>} : vector<8x8xf32>, vector<8x512xf32>, vector<8x512xf32> -> vector<8x512xf32>
    %c0_16 = arith.constant 0 : index
    %c0_17 = arith.constant 0 : index
    %c0_18 = arith.constant 0 : index
    %53 = vector.load %arg6[%c0_16, %c0_17, %c0_18] : memref<2x8x1xf32, #tpu.memory_space<vmem>>, vector<1x8x1xf32>
    %54 = vector.shape_cast %53 : vector<1x8x1xf32> to vector<8x1xf32>
    %55 = vector.broadcast %54 : vector<8x1xf32> to vector<8x512xf32>
    %56 = arith.addf %52, %55 : vector<8x512xf32>
    %57 = arith.addf %1, %56 : vector<8x512xf32>
    %cst_19 = arith.constant 0.000000e+00 : f32
    %58 = vector.broadcast %cst_19 : f32 to vector<8x512xf32>
    %59 = arith.maximumf %57, %58 : vector<8x512xf32>
    %c17_i32_20 = arith.constant 17 : i32
    %60 = tpu.dynamic_rotate %59 by %c17_i32_20 dim 1 : vector<8x512xf32>, i32 -> vector<8x512xf32>
    %61 = vector.broadcast %3 : vector<1x512xf32> to vector<8x512xf32>
    %62 = arith.mulf %60, %61 : vector<8x512xf32>
    %c16_i32_21 = arith.constant 16 : i32
    %63 = tpu.dynamic_rotate %59 by %c16_i32_21 dim 1 : vector<8x512xf32>, i32 -> vector<8x512xf32>
    %64 = vector.broadcast %4 : vector<1x512xf32> to vector<8x512xf32>
    %65 = arith.mulf %63, %64 : vector<8x512xf32>
    %c15_i32_22 = arith.constant 15 : i32
    %66 = tpu.dynamic_rotate %59 by %c15_i32_22 dim 1 : vector<8x512xf32>, i32 -> vector<8x512xf32>
    %67 = vector.broadcast %5 : vector<1x512xf32> to vector<8x512xf32>
    %68 = arith.mulf %66, %67 : vector<8x512xf32>
    %c1_i32_23 = arith.constant 1 : i32
    %69 = tpu.dynamic_rotate %59 by %c1_i32_23 dim 1 : vector<8x512xf32>, i32 -> vector<8x512xf32>
    %70 = vector.broadcast %6 : vector<1x512xf32> to vector<8x512xf32>
    %71 = arith.mulf %69, %70 : vector<8x512xf32>
    %72 = vector.broadcast %7 : vector<1x512xf32> to vector<8x512xf32>
    %73 = arith.mulf %59, %72 : vector<8x512xf32>
    %c511_i32_24 = arith.constant 511 : i32
    %74 = tpu.dynamic_rotate %59 by %c511_i32_24 dim 1 : vector<8x512xf32>, i32 -> vector<8x512xf32>
    %75 = vector.broadcast %8 : vector<1x512xf32> to vector<8x512xf32>
    %76 = arith.mulf %74, %75 : vector<8x512xf32>
    %c497_i32_25 = arith.constant 497 : i32
    %77 = tpu.dynamic_rotate %59 by %c497_i32_25 dim 1 : vector<8x512xf32>, i32 -> vector<8x512xf32>
    %78 = vector.broadcast %9 : vector<1x512xf32> to vector<8x512xf32>
    %79 = arith.mulf %77, %78 : vector<8x512xf32>
    %c496_i32_26 = arith.constant 496 : i32
    %80 = tpu.dynamic_rotate %59 by %c496_i32_26 dim 1 : vector<8x512xf32>, i32 -> vector<8x512xf32>
    %81 = vector.broadcast %10 : vector<1x512xf32> to vector<8x512xf32>
    %82 = arith.mulf %80, %81 : vector<8x512xf32>
    %c495_i32_27 = arith.constant 495 : i32
    %83 = tpu.dynamic_rotate %59 by %c495_i32_27 dim 1 : vector<8x512xf32>, i32 -> vector<8x512xf32>
    %84 = vector.broadcast %11 : vector<1x512xf32> to vector<8x512xf32>
    %85 = arith.mulf %83, %84 : vector<8x512xf32>
    %86 = tpu.concatenate %62, %65, %68, %71, %73, %76, %79, %82, %85 in 0 : vector<8x512xf32>, vector<8x512xf32>, vector<8x512xf32>, vector<8x512xf32>, vector<8x512xf32>, vector<8x512xf32>, vector<8x512xf32>, vector<8x512xf32>, vector<8x512xf32> -> vector<72x512xf32>
    %c1 = arith.constant 1 : index
    %c0_28 = arith.constant 0 : index
    %c0_29 = arith.constant 0 : index
    %87 = vector.load %arg3[%c1, %c0_28, %c0_29] : memref<2x8x72xf32, #tpu.memory_space<vmem>>, vector<1x8x72xf32>
    %88 = vector.shape_cast %87 : vector<1x8x72xf32> to vector<8x72xf32>
    %cst_30 = arith.constant dense<0.000000e+00> : vector<8x512xf32>
    %89 = tpu.matmul %88, %86, %cst_30 {dimension_numbers = #tpu.dot_dimension_numbers<[1], [0], [0], [1], [0, 0, 1, 1], [], []>} : vector<8x72xf32>, vector<72x512xf32>, vector<8x512xf32> -> vector<8x512xf32>
    %c1_31 = arith.constant 1 : index
    %c0_32 = arith.constant 0 : index
    %c0_33 = arith.constant 0 : index
    %90 = vector.load %arg4[%c1_31, %c0_32, %c0_33] : memref<2x8x1xf32, #tpu.memory_space<vmem>>, vector<1x8x1xf32>
    %91 = vector.shape_cast %90 : vector<1x8x1xf32> to vector<8x1xf32>
    %92 = vector.broadcast %91 : vector<8x1xf32> to vector<8x512xf32>
    %93 = arith.addf %89, %92 : vector<8x512xf32>
    %cst_34 = arith.constant 0.000000e+00 : f32
    %94 = vector.broadcast %cst_34 : f32 to vector<8x512xf32>
    %95 = arith.maximumf %93, %94 : vector<8x512xf32>
    %c1_35 = arith.constant 1 : index
    %c0_36 = arith.constant 0 : index
    %c0_37 = arith.constant 0 : index
    %96 = vector.load %arg5[%c1_35, %c0_36, %c0_37] : memref<2x8x8xf32, #tpu.memory_space<vmem>>, vector<1x8x8xf32>
    %97 = vector.shape_cast %96 : vector<1x8x8xf32> to vector<8x8xf32>
    %cst_38 = arith.constant dense<0.000000e+00> : vector<8x512xf32>
    %98 = tpu.matmul %97, %95, %cst_38 {dimension_numbers = #tpu.dot_dimension_numbers<[1], [0], [0], [1], [0, 0, 1, 1], [], []>} : vector<8x8xf32>, vector<8x512xf32>, vector<8x512xf32> -> vector<8x512xf32>
    %c1_39 = arith.constant 1 : index
    %c0_40 = arith.constant 0 : index
    %c0_41 = arith.constant 0 : index
    %99 = vector.load %arg6[%c1_39, %c0_40, %c0_41] : memref<2x8x1xf32, #tpu.memory_space<vmem>>, vector<1x8x1xf32>
    %100 = vector.shape_cast %99 : vector<1x8x1xf32> to vector<8x1xf32>
    %101 = vector.broadcast %100 : vector<8x1xf32> to vector<8x512xf32>
    %102 = arith.addf %98, %101 : vector<8x512xf32>
    %103 = arith.addf %57, %102 : vector<8x512xf32>
    %cst_42 = arith.constant 0.000000e+00 : f32
    %104 = vector.broadcast %cst_42 : f32 to vector<8x512xf32>
    %105 = arith.maximumf %103, %104 : vector<8x512xf32>
    %c0_43 = arith.constant 0 : index
    %c0_44 = arith.constant 0 : index
    %c0_45 = arith.constant 0 : index
    %106 = vector.load %arg7[%c0_43, %c0_44, %c0_45] : memref<1x8x512xf32, #tpu.memory_space<vmem>>, vector<1x8x512xf32>
    %107 = vector.shape_cast %106 : vector<1x8x512xf32> to vector<8x512xf32>
    %108 = vector.shape_cast %105 : vector<8x512xf32> to vector<1x8x512xf32>
    tpu.vector_store %arg7[%c0_43, %c0_44, %c0_45], %108 {strides = array<i32>} : memref<1x8x512xf32, #tpu.memory_space<vmem>>, vector<1x8x512xf32>,
    return
  }
  func.func @transform_0(%arg0: i32) -> (i32, i32, i32) {
    %c0_i32 = arith.constant 0 : i32
    %c0_i32_0 = arith.constant 0 : i32
    %c0_i32_1 = arith.constant 0 : i32
    return %arg0, %c0_i32, %c0_i32_0 : i32, i32, i32
  }
  func.func @transform_1(%arg0: i32) -> (i32, i32) {
    %c0_i32 = arith.constant 0 : i32
    %c0_i32_0 = arith.constant 0 : i32
    %c0_i32_1 = arith.constant 0 : i32
    return %c0_i32, %c0_i32_0 : i32, i32
  }
  func.func @transform_2(%arg0: i32) -> (i32, i32, i32) {
    %c0_i32 = arith.constant 0 : i32
    %c0_i32_0 = arith.constant 0 : i32
    %c0_i32_1 = arith.constant 0 : i32
    %c0_i32_2 = arith.constant 0 : i32
    return %c0_i32, %c0_i32_0, %c0_i32_1 : i32, i32, i32
  }
  func.func @transform_3(%arg0: i32) -> (i32, i32, i32) {
    %c0_i32 = arith.constant 0 : i32
    %c0_i32_0 = arith.constant 0 : i32
    %c0_i32_1 = arith.constant 0 : i32
    %c0_i32_2 = arith.constant 0 : i32
    return %c0_i32, %c0_i32_0, %c0_i32_1 : i32, i32, i32
  }
  func.func @transform_4(%arg0: i32) -> (i32, i32, i32) {
    %c0_i32 = arith.constant 0 : i32
    %c0_i32_0 = arith.constant 0 : i32
    %c0_i32_1 = arith.constant 0 : i32
    %c0_i32_2 = arith.constant 0 : i32
    return %c0_i32, %c0_i32_0, %c0_i32_1 : i32, i32, i32
  }
  func.func @transform_5(%arg0: i32) -> (i32, i32, i32) {
    %c0_i32 = arith.constant 0 : i32
    %c0_i32_0 = arith.constant 0 : i32
    %c0_i32_1 = arith.constant 0 : i32
    %c0_i32_2 = arith.constant 0 : i32
    return %c0_i32, %c0_i32_0, %c0_i32_1 : i32, i32, i32
  }
  func.func @transform_6(%arg0: i32) -> (i32, i32, i32) {
    %c0_i32 = arith.constant 0 : i32
    %c0_i32_0 = arith.constant 0 : i32
    %c0_i32_1 = arith.constant 0 : i32
    return %arg0, %c0_i32, %c0_i32_0 : i32, i32, i32
  }
}

</mosaic_0001>

<bundles_post_ra>
// kernel: tpu_custom_call.1
= control target key start
LH: loop header
LB: loop body
LE: loop exit
PB: predicated region body
PF: predicated region fallthrough
CT: control target
= control target key end

     0   :  { %11 = vsyncpa [#allocation3], 0  ;;  %s1898_s0 = inlined_call_operand.vmem [shape: f32[1,8,512], index: 0, kind: input, shape index: {}]   ;;  %s1899_s1 = inlined_call_operand.hbm [shape: f32[9,512], index: 1, kind: input, shape index: {}]   ;;  %s1900_s2 = inlined_call_operand.hbm [shape: f32[2,8,72], index: 2, kind: input, shape index: {}]   ;;  %s1901_s3 = inlined_call_operand.vmem [shape: f32[2,8,1], index: 3, kind: input, shape index: {}]   ;;  %s1902_s4 = inlined_call_operand.hbm [shape: f32[2,8,8], index: 4, kind: input, shape index: {}]   ;;  %s1903_s5 = inlined_call_operand.vmem [shape: f32[2,8,1], index: 5, kind: input, shape index: {}]   ;;  %s1904_s6 = inlined_call_operand.hbm [shape: f32[1,8,512], index: 6, kind: output, shape index: {}]  }
   0x1   :  { %12 = vsyncpa [#allocation6], 0 }
   0x2   :  { %13 = vsyncpa [#allocation4], 0  ;;  %s1277_s21 = smov [#allocation5]  }
   0x3   :  { %s33_s22 = sshll.u32 %s1277_s21, 4  ;;  %s34_s22 = int_to_ptr.vmem [resolvable:$true] %s33_s22 }
   0x4   :  { %s1199_s23 = scalar_lea.vmem %s34_s22, 256  ;;  %p1204_p1 = scmp.lt.s32.totalorder %s34_s22, %s34_s22 }
   0x5   :  { %p1200_p0 = scmp.ne.s32.totalorder %s34_s22, %s1199_s23  ;;  %p1205_p2 = scmp.lt.s32.totalorder %s1199_s23, %s1199_s23 }
   0x7   :  { %p1206_p3 = por %p1205_p2, %p1204_p1 }
   0x9   :  { %p1207_p4 = pnand %p1206_p3, %p1200_p0 }
   0xb   :  { %1210 = shalt.err (!%p1207_p4)
}
   0xc   :  { %s1278_s24 = smov 128   ;;  %s1279_s25 = smov 8  }
   0xd   :  { %39 = dma.hbm_to_vmem [thread:$0]  %s1900_s2, 256, %s34_s22, [#allocation6], %s1278_s24, %s1278_s24, %s1279_s25  }
   0xe   :  { %s1280_s28 = smov [#allocation2]  }
   0xf   :  { %s21_s29 = sshll.u32 %s1280_s28, 4  ;;  %s22_s29 = int_to_ptr.vmem [resolvable:$true] %s21_s29 }
  0x10   :  { %s1219_s30 = scalar_lea.vmem %s22_s29, 1024  ;;  %p1224_p6 = scmp.lt.s32.totalorder %s22_s29, %s22_s29 }
  0x11   :  { %p1220_p5 = scmp.ne.s32.totalorder %s22_s29, %s1219_s30  ;;  %p1225_p7 = scmp.lt.s32.totalorder %s1219_s30, %s1219_s30 }
  0x13   :  { %p1226_p8 = por %p1225_p7, %p1224_p6 }
  0x15   :  { %p1227_p9 = pnand %p1226_p8, %p1220_p5 }
  0x17   :  { %1230 = shalt.err (!%p1227_p9)
}
  0x18   :  { %s1281_s7 = smov 512   ;;  %s1282_s8 = smov 32  }
  0x19   :  { %27 = dma.hbm_to_vmem [thread:$0]  %s1899_s1, 1024, %s22_s29, [#allocation3], %s1281_s7, %s1281_s7, %s1282_s8  }
  0x1a   :  { %s1283_s11 = smov [#allocation7]  }
  0x1b   :  { %s47_s12 = sshll.u32 %s1283_s11, 4  ;;  %s48_s12 = int_to_ptr.vmem [resolvable:$true] %s47_s12 }
  0x1c   :  { %s1239_s2 = scalar_lea.vmem %s48_s12, 256  ;;  %p1244_p11 = scmp.lt.s32.totalorder %s48_s12, %s48_s12 }
  0x1d   :  { %p1240_p10 = scmp.ne.s32.totalorder %s48_s12, %s1239_s2  ;;  %p1245_p12 = scmp.lt.s32.totalorder %s1239_s2, %s1239_s2 }
  0x1f   :  { %p1246_p13 = por %p1245_p12, %p1244_p11 }
  0x21   :  { %p1247_p0 = pnand %p1246_p13, %p1240_p10 }
  0x23   :  { %1250 = shalt.err (!%p1247_p0)
}
  0x24   :  { %53 = dma.hbm_to_vmem [thread:$0]  %s1902_s4, 256, %s48_s12, [#allocation6], %s1278_s24, %s1278_s24, %s1279_s25  }
  0x25   :  { %1271 = dma.done.wait [#allocation3], 1024  }
  0x26   :  { %1272 = vsyncadd [#allocation3], 4294966272 }
  0x27   :  { %1273 = dma.done.wait [#allocation6], 512  }
  0x28   :  { %1274 = vsyncadd [#allocation6], 4294966784  ;;  %v1342_v0 = vld [vmem:[%s1898_s0 + $0x10] sm:$0xff]  ;;  %v1347_v1 = vld [vmem:[%s1898_s0] sm:$0xff]  ;;  %s1284_s21 = smov 111   ;;  %s1286_s22 = smov 113   ;;  %v89_v11 = vlaneseq }
  0x29   :  { %v1352_v2 = vld [vmem:[%s1898_s0 + $0x18] sm:$0xff]  ;;  %v1355_v3 = vmax.f32 %v1342_v0, 0.0  ;;  %v1358_v4 = vmax.f32 %v1347_v1, 0.0  ;;  %v1363_v5 = vld [vmem:[%s1898_s0 + $0x8] sm:$0xff]  ;;  %s1285_s0 = smov 112   ;;  %s1287_s23 = smov 127  }
  0x2a   :  { %v1370_v6 = vmax.f32 %v1352_v2, 0.0  ;;  %v1373_v7 = vmax.f32 %v1363_v5, 0.0  ;;  %s1288_s24 = smov 1   ;;  %s1289_s25 = smov 15   ;;  %v1291_v8 = vmov 0.0   ;;  %v1292_v9 = vmov 0  }
  0x2b   :  { %338 = vrot.lane.b32.xlu1 %v1355_v3, %s1284_s21  ;;  %334 = vrot.lane.b32.xlu0 %v1358_v4, %s1284_s21  ;;  %s1290_s26 = smov 16   ;;  %s1293_s27 = smov 17   ;;  %v368_v10 = vld [vmem:[%s1901_s3] sm:$0xff]  ;;  %v1440_v12 = vand.u32 127, %v89_v11  ;;  %v1443_v15 = vld [vmem:[#allocation2 + $0x28] ss:$0 sm:$0xff] }
  0x2c   :  { %442 = vmatprep.mubr.f32.mxu0 %v1291_v8  ;;  %513 = vmatprep.mubr.f32.mxu1 %v1291_v8  ;;  %v1445_v16 = vshrl.u32 %v89_v11, 7  ;;  %v1447_v17 = vld [vmem:[#allocation2 + $0x38] ss:$0 sm:$0xff]  ;;  %v1449_v18 = vld [vmem:[#allocation2 + $0x20] ss:$0 sm:$0xff]  ;;  %v1468_v32 = vld [vmem:[#allocation2 + $0x8] sm:$0xff] }
  0x2d   :  { %1189 = vset.pattern.permute.xlu0 %v1292_v9  ;;  %1190 = vset.pattern.permute.xlu1 %v1292_v9  ;;  %vm342_vm0 = vcmp.lt.s32.totalorder %v1440_v12, 111  ;;  %v1451_v19 = vld [vmem:[#allocation2 + $0x30] ss:$0 sm:$0xff]  ;;  %v1466_v31 = vld [vmem:[#allocation2 + $0x18] sm:$0xff]  ;;  %v1472_v35 = vld [vmem:[#allocation2] sm:$0xff]  ;;  %vm309_vm1 = vcmp.lt.s32.totalorder %v1440_v12, 112 }
  0x2e   :  { %v316_v30 = vsub.s32 7, %v1445_v16  ;;  %v1470_v33 = vld [vmem:[#allocation2 + $0x10] sm:$0xff]  ;;  %v283_v51 = vsub.s32 6, %v1445_v16  ;;  %vm276_vm2 = vcmp.lt.s32.totalorder %v1440_v12, 113  ;;  %v217_v9 = vsub.s32 4, %v1445_v16 }
  0x2f   :  { %340 = vrot.lane.b32.xlu1 %v1370_v6, %s1284_s21  ;;  %336 = vrot.lane.b32.xlu0 %v1373_v7, %s1284_s21  ;;  %vm243_vm3 = vcmp.lt.s32.totalorder %v1440_v12, 127  ;;  %vm190_vm4 = vcmp.lt.s32.totalorder %v1440_v12, 1  ;;  %vm157_vm5 = vcmp.lt.s32.totalorder %v1440_v12, 15  ;;  %vm124_vm6 = vcmp.lt.s32.totalorder %v1440_v12, 16 }
  0x30   :  { %v1476_v37 = vrot.slane %v1466_v31, %v316_v30  ;;  %v1479_v38 = vrot.slane %v1468_v32, %v316_v30  ;;  %v1482_v39 = vrot.slane %v1470_v33, %v316_v30  ;;  %v1485_v40 = vrot.slane %v1472_v35, %v316_v30 }
  0x31   :  { %v1502_v54 = vrot.slane %v1466_v31, %v283_v51  ;;  %v1505_v55 = vrot.slane %v1468_v32, %v283_v51  ;;  %v1508_v56 = vrot.slane %v1470_v33, %v283_v51  ;;  %v1511_v57 = vrot.slane %v1472_v35, %v283_v51 }
  0x32   :  { %v1548_v30 = vrot.slane %v1472_v35, %v217_v9  ;;  %vm91_vm7 = vcmp.lt.s32.totalorder %v1440_v12, 17  ;;  %vm374_vm8 = vcmask 588800   ;;  %vm531_vm9 = vcmask 64512  }
  0x33   :  { %303 = vrot.lane.b32.xlu1 %v1373_v7, %s1285_s0  ;;  %301 = vrot.lane.b32.xlu0 %v1358_v4, %s1285_s0 }
  0x37   :  { %307 = vrot.lane.b32.xlu1 %v1370_v6, %s1285_s0  ;;  %305 = vrot.lane.b32.xlu0 %v1355_v3, %s1285_s0 }
  0x3b   :  { %270 = vrot.lane.b32.xlu1 %v1373_v7, %s1286_s22  ;;  %268 = vrot.lane.b32.xlu0 %v1358_v4, %s1286_s22 }
  0x3f   :  { %274 = vrot.lane.b32.xlu1 %v1370_v6, %s1286_s22  ;;  %272 = vrot.lane.b32.xlu0 %v1355_v3, %s1286_s22 }
  0x43   :  { %237 = vrot.lane.b32.xlu1 %v1373_v7, %s1287_s23  ;;  %235 = vrot.lane.b32.xlu0 %v1358_v4, %s1287_s23 }
  0x47   :  { %241 = vrot.lane.b32.xlu1 %v1370_v6, %s1287_s23  ;;  %239 = vrot.lane.b32.xlu0 %v1355_v3, %s1287_s23 }
  0x4b   :  { %184 = vrot.lane.b32.xlu1 %v1373_v7, %s1288_s24  ;;  %182 = vrot.lane.b32.xlu0 %v1358_v4, %s1288_s24 }
  0x4f   :  { %188 = vrot.lane.b32.xlu1 %v1370_v6, %s1288_s24  ;;  %186 = vrot.lane.b32.xlu0 %v1355_v3, %s1288_s24 }
  0x53   :  { %151 = vrot.lane.b32.xlu1 %v1373_v7, %s1289_s25  ;;  %149 = vrot.lane.b32.xlu0 %v1358_v4, %s1289_s25 }
  0x57   :  { %155 = vrot.lane.b32.xlu1 %v1370_v6, %s1289_s25  ;;  %153 = vrot.lane.b32.xlu0 %v1355_v3, %s1289_s25 }
  0x5b   :  { %118 = vrot.lane.b32.xlu1 %v1373_v7, %s1290_s26  ;;  %116 = vrot.lane.b32.xlu0 %v1358_v4, %s1290_s26 }
  0x5f   :  { %122 = vrot.lane.b32.xlu1 %v1370_v6, %s1290_s26  ;;  %120 = vrot.lane.b32.xlu0 %v1355_v3, %s1290_s26 }
  0x63   :  { %83 = vrot.lane.b32.xlu1 %v1373_v7, %s1293_s27  ;;  %81 = vrot.lane.b32.xlu0 %v1358_v4, %s1293_s27 }
  0x67   :  { %87 = vrot.lane.b32.xlu1 %v1370_v6, %s1293_s27  ;;  %85 = vrot.lane.b32.xlu0 %v1355_v3, %s1293_s27 }
  0x6b   :  { %371 = vperm.xlu0 %1189, %v368_v10  }
  0x9d   :  { %v339_v13 = vpop.permute.xlu1 %338  ;;  %v335_v14 = vpop.permute.xlu0 %334 }
  0xa1   :  { %v341_v20 = vpop.permute.xlu1 %340  ;;  %v337_v21 = vpop.permute.xlu0 %336 }
  0xa2   :  { %v343_v22 = vsel %vm342_vm0, %v339_v13, %v341_v20  ;;  %v345_v23 = vsel %vm342_vm0, %v335_v14, %v337_v21  ;;  %v344_v24 = vsel %vm342_vm0, %v337_v21, %v339_v13  ;;  %v346_v25 = vsel %vm342_vm0, %v341_v20, %v335_v14 }
  0xa3   :  { %v364_v26 = vmul.f32 %v1443_v15, %v344_v24  ;;  %v366_v27 = vmul.f32 %v1447_v17, %v346_v25  ;;  %v363_v28 = vmul.f32 %v1449_v18, %v345_v23  ;;  %v365_v29 = vmul.f32 %v1451_v19, %v343_v22 }
  0xa4   :  { %v250_v20 = vsub.s32 5, %v1445_v16  ;;  %v197_v23 = vsub.s32 3, %v1445_v16  ;;  %v1530_v24 = vrot.slane %v1468_v32, %v217_v9 }
  0xa5   :  { %v304_v34 = vpop.permute.xlu1 %303  ;;  %392 = vmatprep.subr.mxu0 %v364_v26  ;;  %463 = vmatprep.subr.mxu1 %v366_v27  ;;  %v302_v36 = vpop.permute.xlu0 %301 }
  0xa6   :  { %393 = vmatpush1.msra.mxu0 %v363_v28  ;;  %464 = vmatpush1.msra.mxu1 %v365_v29  ;;  %v312_v41 = vsel %vm309_vm1, %v302_v36, %v304_v34  ;;  %v1533_v25 = vrot.slane %v1466_v31, %v250_v20  ;;  %v1536_v26 = vrot.slane %v1468_v32, %v250_v20 }
  0xa7   :  { %v330_v50 = vmul.f32 %v1485_v40, %v312_v41  ;;  %v1539_v27 = vrot.slane %v1470_v33, %v250_v20  ;;  %v1542_v28 = vrot.slane %v1466_v31, %v217_v9  ;;  %v1545_v29 = vrot.slane %v1472_v35, %v250_v20 }
  0xa9   :  { %v308_v42 = vpop.permute.xlu1 %307  ;;  %v306_v43 = vpop.permute.xlu0 %305  ;;  %v234_v51 = vmul.f32 %v1542_v28, %v1370_v6 }
  0xaa   :  { %v313_v44 = vsel %vm309_vm1, %v308_v42, %v302_v36  ;;  %v310_v45 = vsel %vm309_vm1, %v306_v43, %v308_v42  ;;  %v311_v46 = vsel %vm309_vm1, %v304_v34, %v306_v43  ;;  %v1551_v34 = vrot.slane %v1470_v33, %v217_v9 }
  0xab   :  { %v333_v47 = vmul.f32 %v1476_v37, %v313_v44  ;;  %v331_v48 = vmul.f32 %v1479_v38, %v311_v46  ;;  %v332_v49 = vmul.f32 %v1482_v39, %v310_v45  ;;  %v1557_v43 = vrot.slane %v1468_v32, %v197_v23 }
  0xad   :  { %v271_v52 = vpop.permute.xlu1 %270  ;;  %394 = vmatprep.subr.mxu0 %v331_v48  ;;  %465 = vmatprep.subr.mxu1 %v333_v47  ;;  %v269_v53 = vpop.permute.xlu0 %268  ;;  %v232_v47 = vmul.f32 %v1530_v24, %v1373_v7 }
  0xae   :  { %395 = vmatpush1.msra.mxu0 %v330_v50  ;;  %466 = vmatpush1.msra.mxu1 %v332_v49  ;;  %v279_v58 = vsel %vm276_vm2, %v269_v53, %v271_v52 }
  0xaf   :  { %v297_v14 = vmul.f32 %v1511_v57, %v279_v58  ;;  %v233_v58 = vmul.f32 %v1551_v34, %v1355_v3  ;;  %v1587_v3 = vrot.slane %v1466_v31, %v197_v23 }
  0xb1   :  { %v275_v59 = vpop.permute.xlu1 %274  ;;  %v273_v60 = vpop.permute.xlu0 %272 }
  0xb2   :  { %v280_v61 = vsel %vm276_vm2, %v275_v59, %v269_v53  ;;  %v277_v62 = vsel %vm276_vm2, %v273_v60, %v275_v59  ;;  %v278_v63 = vsel %vm276_vm2, %v271_v52, %v273_v60  ;;  %v231_v53 = vmul.f32 %v1548_v30, %v1358_v4 }
  0xb3   :  { %v300_v10 = vmul.f32 %v1502_v54, %v280_v61  ;;  %v298_v11 = vmul.f32 %v1505_v55, %v278_v63  ;;  %v299_v13 = vmul.f32 %v1508_v56, %v277_v62  ;;  %v1580_v61 = vrot.slane %v1472_v35, %v197_v23 }
  0xb4   :  { %v1584_v4 = vrot.slane %v1470_v33, %v197_v23  ;;  %v164_v62 = vsub.s32 2, %v1445_v16 }
  0xb5   :  { %v238_v21 = vpop.permute.xlu1 %237  ;;  %396 = vmatprep.subr.mxu0 %v298_v11  ;;  %467 = vmatprep.subr.mxu1 %v300_v10  ;;  %v236_v22 = vpop.permute.xlu0 %235 }
  0xb6   :  { %397 = vmatpush1.msra.mxu0 %v297_v14  ;;  %468 = vmatpush1.msra.mxu1 %v299_v13  ;;  %v246_v36 = vsel %vm243_vm3, %v236_v22, %v238_v21 }
  0xb7   :  { %v264_v52 = vmul.f32 %v1545_v29, %v246_v36 }
  0xb9   :  { %v242_v41 = vpop.permute.xlu1 %241  ;;  %v240_v42 = vpop.permute.xlu0 %239 }
  0xba   :  { %v247_v44 = vsel %vm243_vm3, %v242_v41, %v236_v22  ;;  %v244_v45 = vsel %vm243_vm3, %v240_v42, %v242_v41  ;;  %v245_v46 = vsel %vm243_vm3, %v238_v21, %v240_v42  ;;  %v1601_v22 = vrot.slane %v1468_v32, %v164_v62 }
  0xbb   :  { %v267_v48 = vmul.f32 %v1533_v25, %v247_v44  ;;  %v265_v49 = vmul.f32 %v1536_v26, %v245_v46  ;;  %v266_v50 = vmul.f32 %v1539_v27, %v244_v45  ;;  %v1606_v42 = vrot.slane %v1472_v35, %v164_v62 }
  0xbc   :  { %v1610_v45 = vrot.slane %v1470_v33, %v164_v62  ;;  %v1613_v46 = vrot.slane %v1466_v31, %v164_v62 }
  0xbd   :  { %v185_v59 = vpop.permute.xlu1 %184  ;;  %398 = vmatprep.subr.mxu0 %v265_v49  ;;  %469 = vmatprep.subr.mxu1 %v267_v48  ;;  %v183_v7 = vpop.permute.xlu0 %182 }
  0xbe   :  { %v193_v60 = vsel %vm190_vm4, %v183_v7, %v185_v59  ;;  %399 = vmatpush1.msra.mxu0 %v264_v52  ;;  %470 = vmatpush1.msra.mxu1 %v266_v50 }
  0xbf   :  { %v212_v6 = vmul.f32 %v1557_v43, %v193_v60  ;;  %400 = vmatprep.subr.mxu0 %v232_v47  ;;  %471 = vmatprep.subr.mxu1 %v234_v51  ;;  %v131_v47 = vsub.s32 1, %v1445_v16 }
  0xc0   :  { %401 = vmatpush1.msra.mxu0 %v231_v53  ;;  %472 = vmatpush1.msra.mxu1 %v233_v58 }
  0xc1   :  { %v189_v63 = vpop.permute.xlu1 %188  ;;  %v187_v9 = vpop.permute.xlu0 %186  ;;  %402 = vmatprep.subr.mxu0 %v212_v6 }
  0xc2   :  { %v194_v10 = vsel %vm190_vm4, %v189_v63, %v183_v7  ;;  %v191_v11 = vsel %vm190_vm4, %v187_v9, %v189_v63  ;;  %v192_v13 = vsel %vm190_vm4, %v185_v59, %v187_v9  ;;  %v1627_v7 = vrot.slane %v1468_v32, %v131_v47 }
  0xc3   :  { %v211_v14 = vmul.f32 %v1580_v61, %v194_v10  ;;  %v213_v20 = vmul.f32 %v1584_v4, %v192_v13  ;;  %v214_v21 = vmul.f32 %v1587_v3, %v191_v11  ;;  %v1632_v63 = vrot.slane %v1472_v35, %v131_v47 }
  0xc4   :  { %v1636_v10 = vrot.slane %v1470_v33, %v131_v47  ;;  %v1639_v11 = vrot.slane %v1466_v31, %v131_v47  ;;  %v98_v13 = vsub.s32 0, %v1445_v16 }
  0xc5   :  { %v152_v23 = vpop.permute.xlu1 %151  ;;  %473 = vmatprep.subr.mxu1 %v214_v21  ;;  %v150_v36 = vpop.permute.xlu0 %149  ;;  %403 = vmatpush1.msra.mxu0 %v211_v14 }
  0xc6   :  { %v160_v41 = vsel %vm157_vm5, %v150_v36, %v152_v23  ;;  %474 = vmatpush1.msra.mxu1 %v213_v20  ;;  %v1653_v47 = vrot.slane %v1468_v32, %v98_v13 }
  0xc7   :  { %v179_v44 = vmul.f32 %v1601_v22, %v160_v41 }
  0xc9   :  { %v156_v48 = vpop.permute.xlu1 %155  ;;  %v154_v49 = vpop.permute.xlu0 %153  ;;  %404 = vmatprep.subr.mxu0 %v179_v44 }
  0xca   :  { %v161_v50 = vsel %vm157_vm5, %v156_v48, %v150_v36  ;;  %v158_v51 = vsel %vm157_vm5, %v154_v49, %v156_v48  ;;  %v159_v52 = vsel %vm157_vm5, %v152_v23, %v154_v49 }
  0xcb   :  { %v178_v53 = vmul.f32 %v1606_v42, %v161_v50  ;;  %v180_v58 = vmul.f32 %v1610_v45, %v159_v52  ;;  %v181_v59 = vmul.f32 %v1613_v46, %v158_v51  ;;  %v1659_v52 = vrot.slane %v1472_v35, %v98_v13 }
  0xcd   :  { %v119_v60 = vpop.permute.xlu1 %118  ;;  %475 = vmatprep.subr.mxu1 %v181_v59  ;;  %v117_v6 = vpop.permute.xlu0 %116  ;;  %405 = vmatpush1.msra.mxu0 %v178_v53  ;;  %v1662_v53 = vrot.slane %v1470_v33, %v98_v13 }
  0xce   :  { %v127_v62 = vsel %vm124_vm6, %v117_v6, %v119_v60  ;;  %476 = vmatpush1.msra.mxu1 %v180_v58  ;;  %v1665_v58 = vrot.slane %v1466_v31, %v98_v13  ;;  %v367_v31 = vld [vmem:[#allocation5] sm:$0xff] }
  0xcf   :  { %v146_v9 = vmul.f32 %v1627_v7, %v127_v62  ;;  %v525_v13 = vld [vmem:[%s1903_s5] sm:$0xff] }
  0xd0   :  { %528 = vperm.xlu1 %1190, %v525_v13  }
  0xd1   :  { %v123_v14 = vpop.permute.xlu1 %122  ;;  %v121_v20 = vpop.permute.xlu0 %120  ;;  %406 = vmatprep.subr.mxu0 %v146_v9 }
  0xd2   :  { %v128_v21 = vsel %vm124_vm6, %v123_v14, %v117_v6  ;;  %v125_v23 = vsel %vm124_vm6, %v121_v20, %v123_v14  ;;  %v126_v36 = vsel %vm124_vm6, %v119_v60, %v121_v20 }
  0xd3   :  { %v145_v41 = vmul.f32 %v1632_v63, %v128_v21  ;;  %v147_v44 = vmul.f32 %v1636_v10, %v126_v36  ;;  %v148_v16 = vmul.f32 %v1639_v11, %v125_v23 }
  0xd5   :  { %v84_v48 = vpop.permute.xlu1 %83  ;;  %477 = vmatprep.subr.mxu1 %v148_v16  ;;  %v82_v49 = vpop.permute.xlu0 %81  ;;  %407 = vmatpush1.msra.mxu0 %v145_v41 }
  0xd6   :  { %v94_v50 = vsel %vm91_vm7, %v82_v49, %v84_v48  ;;  %478 = vmatpush1.msra.mxu1 %v147_v44 }
  0xd7   :  { %v113_v51 = vmul.f32 %v1653_v47, %v94_v50 }
  0xd9   :  { %v88_v32 = vpop.permute.xlu1 %87  ;;  %v86_v59 = vpop.permute.xlu0 %85  ;;  %408 = vmatprep.subr.mxu0 %v113_v51 }
  0xda   :  { %v95_v60 = vsel %vm91_vm7, %v88_v32, %v82_v49  ;;  %v92_v6 = vsel %vm91_vm7, %v86_v59, %v88_v32  ;;  %v93_v62 = vsel %vm91_vm7, %v84_v48, %v86_v59  ;;  %v524_v32 = vld [vmem:[#allocation7] sm:$0xff] }
  0xdb   :  { %v112_v35 = vmul.f32 %v1659_v52, %v95_v60  ;;  %v114_v33 = vmul.f32 %v1662_v53, %v93_v62  ;;  %v115_v9 = vmul.f32 %v1665_v58, %v92_v6 }
  0xdd   :  { %409 = vmatpush1.msra.mxu0 %v112_v35  ;;  %479 = vmatprep.subr.mxu1 %v115_v9 }
  0xde   :  { %1161 = vmatmul.mubr.msk.f32.vlgmr.msra.gmra.mxu0 %vm374_vm8, %v367_v31  ;;  %480 = vmatpush1.msra.mxu1 %v114_v33 }
  0xdf   :  { %1162 = vmatmul.mubr.msk.f32.vlgmr.msra.gmra.mxu1 %vm374_vm8, %v367_v31  ;;  %599 = vmatprep.mubr.f32.mxu0 %v1291_v8 }
  0xe0   :  { %670 = vmatprep.mubr.f32.mxu1 %v1291_v8 }
  0xe6   :  { %v372_v14 = vpop.permute.xlu0 %371 }
 0x14b   :  { %v529_v60 = vpop.permute.xlu1 %528 }
 0x19e   :  { %v444_v20 = vpop.f32.mrf.mxu0 }
 0x19f   :  { %v515_v21 = vpop.f32.mrf.mxu1  ;;  %v445_v23 = vadd.f32 %v444_v20, %v372_v14 }
 0x1a0   :  { %v446_v36 = vpop.f32.mrf.mxu0  ;;  %v516_v41 = vadd.f32 %v515_v21, %v372_v14 }
 0x1a1   :  { %v447_v44 = vadd.f32 %v446_v36, %v372_v14  ;;  %v517_v16 = vpop.f32.mrf.mxu1  ;;  %v520_v50 = vmax.f32 %v445_v23, 0.0 }
 0x1a2   :  { %v518_v48 = vadd.f32 %v517_v16, %v372_v14  ;;  %v522_v59 = vmax.f32 %v516_v41, 0.0 }
 0x1a3   :  { %v521_v49 = vmax.f32 %v447_v44, 0.0 }
 0x1a4   :  { %v523_v51 = vmax.f32 %v518_v48, 0.0 }
 0x1a5   :  { %565 = vmatprep.subr.mxu0 %v521_v49 }
 0x1a6   :  { %566 = vmatpush1.msra.mxu0 %v520_v50  ;;  %636 = vmatprep.subr.mxu1 %v523_v51 }
 0x1a7   :  { %1163 = vmatmul.mubr.msk.f32.vlgmr.msra.gmra.mxu0 %vm531_vm9, %v524_v32  ;;  %637 = vmatpush1.msra.mxu1 %v522_v59 }
 0x1a8   :  { %1164 = vmatmul.mubr.msk.f32.vlgmr.msra.gmra.mxu1 %vm531_vm9, %v524_v32  ;;  %893 = vmatprep.mubr.f32.mxu0 %v1291_v8 }
 0x1a9   :  { %964 = vmatprep.mubr.f32.mxu1 %v1291_v8 }
 0x267   :  { %v601_v6 = vpop.f32.mrf.mxu0 }
 0x268   :  { %v602_v62 = vadd.f32 %v601_v6, %v529_v60  ;;  %v672_v35 = vpop.f32.mrf.mxu1 }
 0x269   :  { %v673_v33 = vadd.f32 %v672_v35, %v529_v60  ;;  %v603_v9 = vpop.f32.mrf.mxu0 }
 0x26a   :  { %v1688_v31 = vadd.f32 %v602_v62, %v1347_v1  ;;  %v604_v13 = vadd.f32 %v603_v9, %v529_v60  ;;  %v674_v14 = vpop.f32.mrf.mxu1 }
 0x26b   :  { %v675_v20 = vadd.f32 %v674_v14, %v529_v60  ;;  %v1694_v23 = vadd.f32 %v673_v33, %v1342_v0 }
 0x26c   :  { %v1691_v21 = vmax.f32 %v1688_v31, 0.0  ;;  %v1697_v36 = vadd.f32 %v604_v13, %v1363_v5  ;;  %v1168_v5 = vld [vmem:[%s1903_s5 + $0x8] sm:$0xff] }
 0x26d   :  { %v1703_v44 = vadd.f32 %v675_v20, %v1352_v2  ;;  %v1708_v1 = vmax.f32 %v1694_v23, 0.0  ;;  %v1165_v2 = vld [vmem:[%s1901_s3 + $0x8] sm:$0xff]  ;;  %s1294_s3 = smov [#allocation8]  }
 0x26e   :  { %v1700_v41 = vmax.f32 %v1697_v36, 0.0  ;;  %801 = vrot.lane.b32.xlu1 %v1691_v21, %s1284_s21  ;;  %s1147_s5 = sshll.u32 %s1294_s3, 4  ;;  %s1148_s5 = int_to_ptr.vmem [resolvable:$true] %s1147_s5 }
 0x26f   :  { %v1713_v0 = vmax.f32 %v1703_v44, 0.0  ;;  %s1251_s12 = scalar_lea.vmem %s1148_s5, 512  ;;  %p1256_p2 = scmp.lt.s32.totalorder %s1148_s5, %s1148_s5 }
 0x270   :  { %803 = vrot.lane.b32.xlu0 %v1700_v41, %s1284_s21  ;;  %p1252_p1 = scmp.ne.s32.totalorder %s1148_s5, %s1251_s12  ;;  %p1257_p3 = scmp.lt.s32.totalorder %s1251_s12, %s1251_s12 }
 0x272   :  { %805 = vrot.lane.b32.xlu1 %v1708_v1, %s1284_s21  ;;  %p1258_p4 = por %p1257_p3, %p1256_p2 }
 0x274   :  { %807 = vrot.lane.b32.xlu0 %v1713_v0, %s1284_s21  ;;  %p1259_p5 = pnand %p1258_p4, %p1252_p1 }
 0x276   :  { %785 = vrot.lane.b32.xlu1 %v1691_v21, %s1285_s0 }
 0x278   :  { %787 = vrot.lane.b32.xlu0 %v1700_v41, %s1285_s0 }
 0x27a   :  { %789 = vrot.lane.b32.xlu1 %v1708_v1, %s1285_s0 }
 0x27c   :  { %791 = vrot.lane.b32.xlu0 %v1713_v0, %s1285_s0 }
 0x27e   :  { %769 = vrot.lane.b32.xlu1 %v1691_v21, %s1286_s22 }
 0x280   :  { %771 = vrot.lane.b32.xlu0 %v1700_v41, %s1286_s22 }
 0x282   :  { %773 = vrot.lane.b32.xlu1 %v1708_v1, %s1286_s22 }
 0x284   :  { %775 = vrot.lane.b32.xlu0 %v1713_v0, %s1286_s22 }
 0x286   :  { %753 = vrot.lane.b32.xlu1 %v1691_v21, %s1287_s23 }
 0x288   :  { %755 = vrot.lane.b32.xlu0 %v1700_v41, %s1287_s23 }
 0x28a   :  { %757 = vrot.lane.b32.xlu1 %v1708_v1, %s1287_s23 }
 0x28c   :  { %759 = vrot.lane.b32.xlu0 %v1713_v0, %s1287_s23 }
 0x28e   :  { %733 = vrot.lane.b32.xlu1 %v1691_v21, %s1288_s24 }
 0x290   :  { %735 = vrot.lane.b32.xlu0 %v1700_v41, %s1288_s24 }
 0x292   :  { %737 = vrot.lane.b32.xlu1 %v1708_v1, %s1288_s24 }
 0x294   :  { %739 = vrot.lane.b32.xlu0 %v1713_v0, %s1288_s24 }
 0x296   :  { %717 = vrot.lane.b32.xlu1 %v1691_v21, %s1289_s25 }
 0x298   :  { %719 = vrot.lane.b32.xlu0 %v1700_v41, %s1289_s25 }
 0x29a   :  { %721 = vrot.lane.b32.xlu1 %v1708_v1, %s1289_s25 }
 0x29c   :  { %723 = vrot.lane.b32.xlu0 %v1713_v0, %s1289_s25 }
 0x29e   :  { %701 = vrot.lane.b32.xlu1 %v1691_v21, %s1290_s26 }
 0x2a0   :  { %703 = vrot.lane.b32.xlu0 %v1700_v41, %s1290_s26 }
 0x2a2   :  { %705 = vrot.lane.b32.xlu1 %v1708_v1, %s1290_s26 }
 0x2a4   :  { %707 = vrot.lane.b32.xlu0 %v1713_v0, %s1290_s26 }
 0x2a6   :  { %685 = vrot.lane.b32.xlu1 %v1691_v21, %s1293_s27 }
 0x2a8   :  { %687 = vrot.lane.b32.xlu0 %v1700_v41, %s1293_s27 }
 0x2aa   :  { %689 = vrot.lane.b32.xlu1 %v1708_v1, %s1293_s27 }
 0x2ac   :  { %691 = vrot.lane.b32.xlu0 %v1713_v0, %s1293_s27 }
 0x2ae   :  { %823 = vperm.xlu1 %1190, %v1165_v2  }
 0x2b0   :  { %981 = vperm.xlu0 %1189, %v1168_v5  }
 0x2e0   :  { %v802_v16 = vpop.permute.xlu1 %801 }
 0x2e2   :  { %v804_v48 = vpop.permute.xlu0 %803 }
 0x2e3   :  { %v811_v49 = vsel %vm342_vm0, %v802_v16, %v804_v48 }
 0x2e4   :  { %v806_v50 = vpop.permute.xlu1 %805  ;;  %v813_v60 = vmul.f32 %v1449_v18, %v811_v49 }
 0x2e5   :  { %v810_v51 = vsel %vm342_vm0, %v804_v48, %v806_v50 }
 0x2e6   :  { %v814_v32 = vmul.f32 %v1443_v15, %v810_v51  ;;  %v808_v59 = vpop.permute.xlu0 %807 }
 0x2e7   :  { %v809_v6 = vsel %vm342_vm0, %v806_v50, %v808_v59  ;;  %v812_v62 = vsel %vm342_vm0, %v808_v59, %v802_v16 }
 0x2e8   :  { %v815_v35 = vmul.f32 %v1451_v19, %v809_v6  ;;  %v816_v33 = vmul.f32 %v1447_v17, %v812_v62  ;;  %843 = vmatprep.subr.mxu0 %v814_v32  ;;  %v786_v9 = vpop.permute.xlu1 %785 }
 0x2e9   :  { %844 = vmatpush1.msra.mxu0 %v813_v60 }
 0x2ea   :  { %v788_v13 = vpop.permute.xlu0 %787  ;;  %914 = vmatprep.subr.mxu1 %v816_v33 }
 0x2eb   :  { %915 = vmatpush1.msra.mxu1 %v815_v35  ;;  %v795_v15 = vsel %vm309_vm1, %v786_v9, %v788_v13 }
 0x2ec   :  { %v790_v18 = vpop.permute.xlu1 %789  ;;  %v797_v19 = vmul.f32 %v795_v15, %v1485_v40 }
 0x2ed   :  { %v794_v14 = vsel %vm309_vm1, %v788_v13, %v790_v18 }
 0x2ee   :  { %v798_v20 = vmul.f32 %v794_v14, %v1479_v38  ;;  %v792_v2 = vpop.permute.xlu0 %791 }
 0x2ef   :  { %v793_v17 = vsel %vm309_vm1, %v790_v18, %v792_v2  ;;  %v796_v5 = vsel %vm309_vm1, %v792_v2, %v786_v9 }
 0x2f0   :  { %v799_v16 = vmul.f32 %v793_v17, %v1482_v39  ;;  %v800_v48 = vmul.f32 %v796_v5, %v1476_v37  ;;  %845 = vmatprep.subr.mxu0 %v798_v20  ;;  %v770_v49 = vpop.permute.xlu1 %769  ;;  %v752_v17 = vmul.f32 %v1713_v0, %v1542_v28 }
 0x2f1   :  { %846 = vmatpush1.msra.mxu0 %v797_v19  ;;  %v750_v19 = vmul.f32 %v1700_v41, %v1530_v24 }
 0x2f2   :  { %v772_v50 = vpop.permute.xlu0 %771  ;;  %916 = vmatprep.subr.mxu1 %v800_v48 }
 0x2f3   :  { %917 = vmatpush1.msra.mxu1 %v799_v16  ;;  %v779_v38 = vsel %vm276_vm2, %v770_v49, %v772_v50 }
 0x2f4   :  { %v774_v40 = vpop.permute.xlu1 %773  ;;  %v781_v39 = vmul.f32 %v779_v38, %v1511_v57 }
 0x2f5   :  { %v778_v51 = vsel %vm276_vm2, %v772_v50, %v774_v40 }
 0x2f6   :  { %v782_v32 = vmul.f32 %v778_v51, %v1505_v55  ;;  %v776_v59 = vpop.permute.xlu0 %775 }
 0x2f7   :  { %v777_v37 = vsel %vm276_vm2, %v774_v40, %v776_v59  ;;  %v780_v60 = vsel %vm276_vm2, %v776_v59, %v770_v49 }
 0x2f8   :  { %v783_v6 = vmul.f32 %v777_v37, %v1508_v56  ;;  %v784_v62 = vmul.f32 %v780_v60, %v1502_v54  ;;  %847 = vmatprep.subr.mxu0 %v782_v32  ;;  %v754_v35 = vpop.permute.xlu1 %753 }
 0x2f9   :  { %848 = vmatpush1.msra.mxu0 %v781_v39 }
 0x2fa   :  { %v756_v33 = vpop.permute.xlu0 %755  ;;  %918 = vmatprep.subr.mxu1 %v784_v62 }
 0x2fb   :  { %919 = vmatpush1.msra.mxu1 %v783_v6  ;;  %v763_v55 = vsel %vm243_vm3, %v754_v35, %v756_v33 }
 0x2fc   :  { %v758_v57 = vpop.permute.xlu1 %757  ;;  %v765_v56 = vmul.f32 %v763_v55, %v1545_v29 }
 0x2fd   :  { %v762_v9 = vsel %vm243_vm3, %v756_v33, %v758_v57 }
 0x2fe   :  { %v766_v13 = vmul.f32 %v762_v9, %v1536_v26  ;;  %v760_v15 = vpop.permute.xlu0 %759  ;;  %v749_v26 = vmul.f32 %v1691_v21, %v1548_v30 }
 0x2ff   :  { %v761_v54 = vsel %vm243_vm3, %v758_v57, %v760_v15  ;;  %v764_v18 = vsel %vm243_vm3, %v760_v15, %v754_v35 }
 0x300   :  { %v767_v14 = vmul.f32 %v761_v54, %v1539_v27  ;;  %v768_v20 = vmul.f32 %v764_v18, %v1533_v25  ;;  %849 = vmatprep.subr.mxu0 %v766_v13  ;;  %v734_v2 = vpop.permute.xlu1 %733  ;;  %v751_v25 = vmul.f32 %v1708_v1, %v1551_v34  ;;  %v818_v18 = vld [vmem:[#allocation5 + $0x8] sm:$0xff] }
 0x301   :  { %850 = vmatpush1.msra.mxu0 %v765_v56 }
 0x302   :  { %v736_v29 = vpop.permute.xlu0 %735  ;;  %851 = vmatprep.subr.mxu0 %v750_v19  ;;  %920 = vmatprep.subr.mxu1 %v768_v20 }
 0x303   :  { %v743_v27 = vsel %vm190_vm4, %v734_v2, %v736_v29  ;;  %852 = vmatpush1.msra.mxu0 %v749_v26  ;;  %921 = vmatpush1.msra.mxu1 %v767_v14 }
 0x304   :  { %v746_v24 = vmul.f32 %v743_v27, %v1557_v43  ;;  %922 = vmatprep.subr.mxu1 %v752_v17  ;;  %v738_v41 = vpop.permute.xlu1 %737 }
 0x305   :  { %923 = vmatpush1.msra.mxu1 %v751_v25  ;;  %v742_v30 = vsel %vm190_vm4, %v736_v29, %v738_v41  ;;  %v976_v25 = vld [vmem:[#allocation7 + $0x8] sm:$0xff] }
 0x306   :  { %v740_v21 = vpop.permute.xlu0 %739  ;;  %853 = vmatprep.subr.mxu0 %v746_v24  ;;  %v747_v43 = vmul.f32 %v742_v30, %v1584_v4 }
 0x307   :  { %v741_v28 = vsel %vm190_vm4, %v738_v41, %v740_v21  ;;  %v744_v0 = vsel %vm190_vm4, %v740_v21, %v734_v2 }
 0x308   :  { %v745_v5 = vmul.f32 %v744_v0, %v1580_v61  ;;  %v748_v34 = vmul.f32 %v741_v28, %v1587_v3  ;;  %v718_v1 = vpop.permute.xlu1 %717 }
 0x30a   :  { %v720_v16 = vpop.permute.xlu0 %719  ;;  %854 = vmatpush1.msra.mxu0 %v745_v5  ;;  %924 = vmatprep.subr.mxu1 %v748_v34 }
 0x30b   :  { %v727_v48 = vsel %vm157_vm5, %v718_v1, %v720_v16  ;;  %925 = vmatpush1.msra.mxu1 %v747_v43 }
 0x30c   :  { %v730_v49 = vmul.f32 %v727_v48, %v1601_v22  ;;  %v722_v50 = vpop.permute.xlu1 %721 }
 0x30d   :  { %v726_v38 = vsel %vm157_vm5, %v720_v16, %v722_v50 }
 0x30e   :  { %v724_v40 = vpop.permute.xlu0 %723  ;;  %855 = vmatprep.subr.mxu0 %v730_v49  ;;  %v731_v59 = vmul.f32 %v726_v38, %v1610_v45 }
 0x30f   :  { %v725_v61 = vsel %vm157_vm5, %v722_v50, %v724_v40  ;;  %v728_v4 = vsel %vm157_vm5, %v724_v40, %v718_v1 }
 0x310   :  { %v729_v3 = vmul.f32 %v728_v4, %v1606_v42  ;;  %v732_v51 = vmul.f32 %v725_v61, %v1613_v46  ;;  %v702_v32 = vpop.permute.xlu1 %701 }
 0x312   :  { %v704_v22 = vpop.permute.xlu0 %703  ;;  %856 = vmatpush1.msra.mxu0 %v729_v3  ;;  %926 = vmatprep.subr.mxu1 %v732_v51 }
 0x313   :  { %v711_v39 = vsel %vm124_vm6, %v702_v32, %v704_v22  ;;  %927 = vmatpush1.msra.mxu1 %v731_v59 }
 0x314   :  { %v714_v37 = vmul.f32 %v711_v39, %v1627_v7  ;;  %v706_v60 = vpop.permute.xlu1 %705 }
 0x315   :  { %v710_v6 = vsel %vm124_vm6, %v704_v22, %v706_v60 }
 0x316   :  { %v708_v62 = vpop.permute.xlu0 %707  ;;  %857 = vmatprep.subr.mxu0 %v714_v37  ;;  %v715_v55 = vmul.f32 %v710_v6, %v1636_v10 }
 0x317   :  { %v709_v42 = vsel %vm124_vm6, %v706_v60, %v708_v62  ;;  %v712_v45 = vsel %vm124_vm6, %v708_v62, %v702_v32 }
 0x318   :  { %v713_v46 = vmul.f32 %v712_v45, %v1632_v63  ;;  %v716_v35 = vmul.f32 %v709_v42, %v1639_v11  ;;  %v686_v33 = vpop.permute.xlu1 %685 }
 0x31a   :  { %v688_v7 = vpop.permute.xlu0 %687  ;;  %858 = vmatpush1.msra.mxu0 %v713_v46  ;;  %928 = vmatprep.subr.mxu1 %v716_v35 }
 0x31b   :  { %v695_v57 = vsel %vm91_vm7, %v686_v33, %v688_v7  ;;  %929 = vmatpush1.msra.mxu1 %v715_v55 }
 0x31c   :  { %v698_v9 = vmul.f32 %v695_v57, %v1653_v47  ;;  %v690_v13 = vpop.permute.xlu1 %689 }
 0x31d   :  { %v694_v15 = vsel %vm91_vm7, %v688_v7, %v690_v13 }
 0x31e   :  { %v692_v56 = vpop.permute.xlu0 %691  ;;  %859 = vmatprep.subr.mxu0 %v698_v9  ;;  %v699_v14 = vmul.f32 %v694_v15, %v1662_v53 }
 0x31f   :  { %v693_v63 = vsel %vm91_vm7, %v690_v13, %v692_v56  ;;  %v696_v10 = vsel %vm91_vm7, %v692_v56, %v686_v33 }
 0x320   :  { %v697_v11 = vmul.f32 %v696_v10, %v1659_v52  ;;  %v700_v54 = vmul.f32 %v693_v63, %v1665_v58 }
 0x322   :  { %860 = vmatpush1.msra.mxu0 %v697_v11  ;;  %930 = vmatprep.subr.mxu1 %v700_v54 }
 0x323   :  { %1166 = vmatmul.mubr.msk.f32.vlgmr.msra.gmra.mxu0 %vm374_vm8, %v818_v18  ;;  %931 = vmatpush1.msra.mxu1 %v699_v14 }
 0x324   :  { %1167 = vmatmul.mubr.msk.f32.vlgmr.msra.gmra.mxu1 %vm374_vm8, %v818_v18  ;;  %1051 = vmatprep.mubr.f32.mxu0 %v1291_v8 }
 0x325   :  { %1122 = vmatprep.mubr.f32.mxu1 %v1291_v8 }
 0x329   :  { %v824_v47 = vpop.permute.xlu1 %823 }
 0x32b   :  { %v982_v8 = vpop.permute.xlu0 %981 }
 0x3e3   :  { %v895_v12 = vpop.f32.mrf.mxu0 }
 0x3e4   :  { %v966_v20 = vpop.f32.mrf.mxu1  ;;  %v896_v52 = vadd.f32 %v895_v12, %v824_v47 }
 0x3e5   :  { %v897_v2 = vpop.f32.mrf.mxu0  ;;  %v967_v58 = vadd.f32 %v966_v20, %v824_v47 }
 0x3e6   :  { %v898_v19 = vadd.f32 %v897_v2, %v824_v47  ;;  %v968_v26 = vpop.f32.mrf.mxu1  ;;  %v971_v17 = vmax.f32 %v896_v52, 0.0 }
 0x3e7   :  { %v969_v53 = vadd.f32 %v968_v26, %v824_v47  ;;  %v973_v24 = vmax.f32 %v967_v58, 0.0 }
 0x3e8   :  { %v972_v29 = vmax.f32 %v898_v19, 0.0 }
 0x3e9   :  { %v974_v27 = vmax.f32 %v969_v53, 0.0 }
 0x3ea   :  { %1017 = vmatprep.subr.mxu0 %v972_v29 }
 0x3eb   :  { %1018 = vmatpush1.msra.mxu0 %v971_v17  ;;  %1088 = vmatprep.subr.mxu1 %v974_v27 }
 0x3ec   :  { %1169 = vmatmul.mubr.msk.f32.vlgmr.msra.gmra.mxu0 %vm531_vm9, %v976_v25  ;;  %1089 = vmatpush1.msra.mxu1 %v973_v24 }
 0x3ed   :  { %1170 = vmatmul.mubr.msk.f32.vlgmr.msra.gmra.mxu1 %vm531_vm9, %v976_v25 }
 0x4ac   :  { %v1053_v41 = vpop.f32.mrf.mxu0 }
 0x4ad   :  { %v1054_v30 = vadd.f32 %v1053_v41, %v982_v8  ;;  %v1124_v21 = vpop.f32.mrf.mxu1 }
 0x4ae   :  { %v1125_v28 = vadd.f32 %v1124_v21, %v982_v8  ;;  %v1055_v0 = vpop.f32.mrf.mxu0 }
 0x4af   :  { %v1129_v5 = vadd.f32 %v1054_v30, %v1688_v31  ;;  %v1056_v34 = vadd.f32 %v1055_v0, %v982_v8  ;;  %v1126_v1 = vpop.f32.mrf.mxu1 }
 0x4b0   :  { %v1131_v43 = vadd.f32 %v1125_v28, %v1694_v23  ;;  %v1127_v16 = vadd.f32 %v1126_v1, %v982_v8 }
 0x4b1   :  { %v1133_v48 = vmax.f32 %v1129_v5, 0.0  ;;  %v1130_v49 = vadd.f32 %v1056_v34, %v1697_v36 }
 0x4b2   :  { %v1135_v50 = vmax.f32 %v1131_v43, 0.0  ;;  %v1132_v38 = vadd.f32 %v1127_v16, %v1703_v44 }
 0x4b3   :  { %1137 = vst [vmem:[#allocation8] sm:$0xff] %v1133_v48  ;;  %v1134_v40 = vmax.f32 %v1130_v49, 0.0 }
 0x4b4   :  { %1139 = vst [vmem:[#allocation8 + $0x10] sm:$0xff] %v1135_v50  ;;  %v1136_v61 = vmax.f32 %v1132_v38, 0.0 }
 0x4b5   :  { %1138 = vst [vmem:[#allocation8 + $0x8] sm:$0xff] %v1134_v40 }
 0x4b6   :  { %1140 = vst [vmem:[#allocation8 + $0x18] sm:$0xff] %v1136_v61 }
 0x4b7   :  { %1262 = shalt.err (!%p1259_p5)
}
 0x4b8   :  { %1150 = dma.vmem_to_hbm [thread:$0]  %s1148_s5, 512, %s1904_s6, [#allocation4]  }
 0x4b9   :  { %1275 = dma.done.wait [#allocation4], 512  }
 0x4ba   :  { %1276 = vsyncadd [#allocation4], 4294966784 }
 0x4bb   :  { %1154 = vsyncpa [#allocation3], 1 }
 0x4bc   :  { %1155 = vsyncpa [#allocation6], 1 }
 0x4bd   :  { %1156 = vsyncpa [#allocation4], 1 }

</bundles_post_ra>
